<compile_context>
chip_gen: v6e
topology: v6e:2x2x1
jax: 0.10.0
libtpu: 0.0.40
codegen_flags: <defaults>
</compile_context>

<pallas_src>
import jax
import jax.numpy as jnp
from jax import lax
from jax.experimental import pallas as pl
from jax.experimental.pallas import tpu as pltpu

D_IN = 40
D_MODEL = 80
N_HEAD = 2
D_HEAD = D_MODEL // N_HEAD          # 40
D_FF = 256
D_OUT_PAD = 128                      # lane-dense padded output width
LN_EPS = 1e-5
ATTN_SCALE = 1.0 / (D_HEAD ** 0.5)
ROW_TARGET = 128                     # tokens per grid step (use 256 on v6e/v7x)

# bias / LayerNorm vector slab layout (one row each, 256 lanes, f32)
VEC_ROWS = 16
VEC_COLS = 256
(ROW_BP, ROW_BQKV, ROW_BO, ROW_B1, ROW_B2, ROW_BPRED,
 ROW_G1, ROW_BE1, ROW_G2, ROW_BE2) = range(10)


def _layernorm(x, gamma, beta):
    mu = jnp.mean(x, axis=-1, keepdims=True)
    var = jnp.mean((x - mu) ** 2, axis=-1, keepdims=True)
    return (x - mu) * lax.rsqrt(var + LN_EPS) * gamma + beta


def classifier_kernel(mels_ref,
                      wp_ref, wqkv_ref, wo_ref, w1_ref, w2_ref, wpred_ref,
                      vec_ref,
                      out_ref):
    BB, S, _ = mels_ref.shape
    M = BB * S
    bf16 = jnp.bfloat16

    # bias / LN vectors (kept in f32)
    bp    = vec_ref[ROW_BP:ROW_BP + 1, 0:D_MODEL]
    bqkv  = vec_ref[ROW_BQKV:ROW_BQKV + 1, 0:3 * D_MODEL]
    bo    = vec_ref[ROW_BO:ROW_BO + 1, 0:D_MODEL]
    b1    = vec_ref[ROW_B1:ROW_B1 + 1, 0:D_FF]
    b2    = vec_ref[ROW_B2:ROW_B2 + 1, 0:D_MODEL]
    bpred = vec_ref[ROW_BPRED:ROW_BPRED + 1, 0:D_OUT_PAD]
    g1    = vec_ref[ROW_G1:ROW_G1 + 1, 0:D_MODEL]
    be1   = vec_ref[ROW_BE1:ROW_BE1 + 1, 0:D_MODEL]
    g2    = vec_ref[ROW_G2:ROW_G2 + 1, 0:D_MODEL]
    be2   = vec_ref[ROW_BE2:ROW_BE2 + 1, 0:D_MODEL]

    # flatten (batch_block, seq) -> rows so every matmul sees M = BB*S
    x = mels_ref[...].reshape(M, D_IN)

    # prenet: Linear(40 -> 80)
    h = jnp.dot(x.astype(bf16), wp_ref[...],
                preferred_element_type=jnp.float32) + bp              # (M, 80) f32

    # ---- TransformerEncoderLayer, norm_first=True ----
    # self-attention block
    n1 = _layernorm(h, g1, be1)
    qkv = jnp.dot(n1.astype(bf16), wqkv_ref[...],
                  preferred_element_type=jnp.float32) + bqkv          # (M, 240)
    qkv = qkv.reshape(BB, S, 3 * D_MODEL)
    q = qkv[:, :, 0:D_MODEL] * ATTN_SCALE
    k = qkv[:, :, D_MODEL:2 * D_MODEL]
    v = qkv[:, :, 2 * D_MODEL:3 * D_MODEL]

    # D_HEAD=40 (< 128 lanes) makes some sub-vreg lane slicing unavoidable; the
    # per-head dots are batched over the batch-block axis with no explicit .T.
    heads = []
    for hh in range(N_HEAD):
        sl = slice(hh * D_HEAD, (hh + 1) * D_HEAD)
        qh = q[:, :, sl].astype(bf16)
        kh = k[:, :, sl].astype(bf16)
        vh = v[:, :, sl].astype(bf16)
        # scores: contract feature dim (qd,kd->qk), batched over BB
        s = lax.dot_general(qh, kh, (((2,), (2,)), ((0,), (0,))),
                            preferred_element_type=jnp.float32)       # (BB,S,S)
        m = jnp.max(s, axis=-1, keepdims=True)
        p = jnp.exp(s - m)
        p = p * pl.reciprocal(jnp.sum(p, axis=-1, keepdims=True), approx=True)
        heads.append(lax.dot_general(p.astype(bf16), vh,
                                     (((2,), (1,)), ((0,), (0,))),
                                     preferred_element_type=jnp.float32))
    attn = jnp.concatenate(heads, axis=-1).reshape(M, D_MODEL)        # (M, 80)
    attn = jnp.dot(attn.astype(bf16), wo_ref[...],
                   preferred_element_type=jnp.float32) + bo
    h = h + attn

    # feed-forward block (default activation = relu)
    n2 = _layernorm(h, g2, be2)
    ff = jnp.dot(n2.astype(bf16), w1_ref[...],
                 preferred_element_type=jnp.float32) + b1
    ff = jnp.maximum(ff, 0.0)
    ff = jnp.dot(ff.astype(bf16), w2_ref[...],
                 preferred_element_type=jnp.float32) + b2
    h = h + ff                                                        # (M, 80)

    # mean over sequence, then pred_layer into a 128-lane (lane-dense) output
    stats = jnp.mean(h.reshape(BB, S, D_MODEL), axis=1)               # (BB, 80)
    out = jnp.dot(stats.astype(bf16), wpred_ref[...],
                  preferred_element_type=jnp.float32) + bpred         # (BB, 128)
    out_ref[...] = out


def pack_params(params, compute_dtype=jnp.bfloat16):
    """Pack the 20 logical f32 params into 6 bf16 weight slabs + 1 f32 vec slab."""
    (wp, bp, g1, be1, wq, bq, wk, bk, wv, bv, wo, bo,
     g2, be2, w1, b1, w2, b2, wpred, bpred) = params

    wqkv = jnp.concatenate([wq, wk, wv], axis=1)                      # (80, 240)
    bqkv = jnp.concatenate([bq, bk, bv], axis=1)                      # (1, 240)
    wpred_p = jnp.zeros((D_MODEL, D_OUT_PAD), jnp.float32).at[:, :D_MODEL].set(wpred)
    bpred_p = jnp.zeros((1, D_OUT_PAD), jnp.float32).at[:, :D_MODEL].set(bpred)

    vec = jnp.zeros((VEC_ROWS, VEC_COLS), jnp.float32)
    for row, val in [(ROW_BP, bp), (ROW_BQKV, bqkv), (ROW_BO, bo), (ROW_B1, b1),
                     (ROW_B2, b2), (ROW_BPRED, bpred_p), (ROW_G1, g1),
                     (ROW_BE1, be1), (ROW_G2, g2), (ROW_BE2, be2)]:
        vec = vec.at[row, :val.shape[1]].set(val[0])

    weights = tuple(w.astype(compute_dtype) for w in (wp, wqkv, wo, w1, w2, wpred_p))
    return weights, vec


def _pick_batch_block(B, S):
    """Largest divisor of B such that BB*S <= ROW_TARGET (keeps blocks exact)."""
    bb_max = max(1, ROW_TARGET // S)
    bb = 1
    for d in range(1, min(B, bb_max) + 1):
        if B % d == 0:
            bb = d
    return bb


def _full_spec(shape):
    nd = len(shape)
    return pl.BlockSpec(shape, lambda i, _nd=nd: (0,) * _nd)


def classifier_forward(mels, params):
    B, S, _ = mels.shape
    weights, vec = pack_params(params)
    BB = _pick_batch_block(B, S)
    grid = (B // BB,)

    param_specs = [_full_spec(w.shape) for w in weights] + [_full_spec(vec.shape)]
    out = pl.pallas_call(
        classifier_kernel,
        out_shape=jax.ShapeDtypeStruct((B, D_OUT_PAD), jnp.float32),
        grid_spec=pltpu.PrefetchScalarGridSpec(
            num_scalar_prefetch=0,
            grid=grid,
            in_specs=[pl.BlockSpec((BB, S, D_IN), lambda i: (i, 0, 0))] + param_specs,
            out_specs=pl.BlockSpec((BB, D_OUT_PAD), lambda i: (i, 0)),
        ),
        compiler_params=pltpu.CompilerParams(dimension_semantics=("parallel",)),
    )(mels, *weights, vec)
    return out[:, :D_MODEL]


def make_params(key):
    """Deterministic synthetic parameters (already transposed to (in, out))."""
    ks = jax.random.split(key, 21)

    def w(k, shape, scale=0.05):
        return (scale * jax.random.normal(k, shape)).astype(jnp.float32)

    params = [
        w(ks[0], (D_IN, D_MODEL)),              # prenet W
        w(ks[1], (1, D_MODEL)),                 # prenet b
        jnp.ones((1, D_MODEL), jnp.float32),    # norm1 gamma
        jnp.zeros((1, D_MODEL), jnp.float32),   # norm1 beta
        w(ks[2], (D_MODEL, D_MODEL)),           # Wq
        w(ks[3], (1, D_MODEL)),                 # bq
        w(ks[4], (D_MODEL, D_MODEL)),           # Wk
        w(ks[5], (1, D_MODEL)),                 # bk
        w(ks[6], (D_MODEL, D_MODEL)),           # Wv
        w(ks[7], (1, D_MODEL)),                 # bv
        w(ks[8], (D_MODEL, D_MODEL)),           # out_proj W
        w(ks[9], (1, D_MODEL)),                 # out_proj b
        jnp.ones((1, D_MODEL), jnp.float32),    # norm2 gamma
        jnp.zeros((1, D_MODEL), jnp.float32),   # norm2 beta
        w(ks[10], (D_MODEL, D_FF)),             # linear1 W
        w(ks[11], (1, D_FF)),                   # linear1 b
        w(ks[12], (D_FF, D_MODEL)),             # linear2 W
        w(ks[13], (1, D_MODEL)),                # linear2 b
        w(ks[14], (D_MODEL, D_MODEL)),          # pred_layer W
        w(ks[15], (1, D_MODEL)),                # pred_layer b
    ]
    return params


def reference_forward(mels, params):
    """Pure-JAX f32 reference mirroring the PyTorch semantics (eval mode)."""
    (wp, bp, g1, be1, wq, bq, wk, bk, wv, bv, wo, bo,
     g2, be2, w1, b1, w2, b2, wpred, bpred) = params

    def ln(x, g, b):
        mu = jnp.mean(x, axis=-1, keepdims=True)
        var = jnp.mean((x - mu) ** 2, axis=-1, keepdims=True)
        return (x - mu) / jnp.sqrt(var + LN_EPS) * g + b

    h = mels @ wp + bp                                           # (B, S, 80)
    n1 = ln(h, g1, be1)
    q = (n1 @ wq + bq).reshape(*n1.shape[:2], N_HEAD, D_HEAD)
    k = (n1 @ wk + bk).reshape(*n1.shape[:2], N_HEAD, D_HEAD)
    v = (n1 @ wv + bv).reshape(*n1.shape[:2], N_HEAD, D_HEAD)
    s = jnp.einsum("bqhd,bkhd->bhqk", q, k) / jnp.sqrt(float(D_HEAD))
    p = jax.nn.softmax(s, axis=-1)
    a = jnp.einsum("bhqk,bkhd->bqhd", p, v).reshape(*n1.shape[:2], D_MODEL)
    h = h + (a @ wo + bo)
    n2 = ln(h, g2, be2)
    ff = jnp.maximum(n2 @ w1 + b1, 0.0) @ w2 + b2
    h = h + ff
    stats = jnp.mean(h, axis=1)                                  # (B, 80)
    return stats @ wpred + bpred


if __name__ == "__main__":
    B, S = 2, 8
    key = jax.random.PRNGKey(0)
    k_in, k_par = jax.random.split(key)
    mels = jax.random.normal(k_in, (B, S, D_IN), dtype=jnp.float32)
    params = make_params(k_par)

    out = classifier_forward(mels, params)
    out = jax.block_until_ready(out)

    ref = reference_forward(mels, params)
    assert out.shape == (B, D_MODEL)
    # bf16 MXU inputs + approx reciprocal => compare at mixed-precision tolerance
    assert jnp.allclose(out, ref, atol=2e-2, rtol=2e-2), "mismatch vs reference"
    print("KERNEL_OK")
</pallas_src>

<mosaic_0001>
module attributes {stable_mosaic.version = 11 : i64} {
  func.func @classifier_kernel(%arg0: i32, %arg1: memref<2x8x40xf32, #tpu.memory_space<vmem>>, %arg2: memref<40x80xbf16, #tpu.memory_space<vmem>>, %arg3: memref<80x240xbf16, #tpu.memory_space<vmem>>, %arg4: memref<80x80xbf16, #tpu.memory_space<vmem>>, %arg5: memref<80x256xbf16, #tpu.memory_space<vmem>>, %arg6: memref<256x80xbf16, #tpu.memory_space<vmem>>, %arg7: memref<80x128xbf16, #tpu.memory_space<vmem>>, %arg8: memref<16x256xf32, #tpu.memory_space<vmem>>, %arg9: memref<2x128xf32, #tpu.memory_space<vmem>>) attributes {dimension_semantics = [#tpu.dimension_semantics<parallel>], iteration_bounds = array<i64: 1>, scalar_prefetch = 0 : i64, scratch_operands = 0 : i64, tpu.core_type = #tpu.core_type<tc>, window_params = [{transform_indices = @transform_0, window_bounds = array<i64: 2, 8, 40>}, {pipeline_mode = #tpu.pipeline_mode<synchronous>, transform_indices = @transform_1, window_bounds = array<i64: 40, 80>}, {pipeline_mode = #tpu.pipeline_mode<synchronous>, transform_indices = @transform_2, window_bounds = array<i64: 80, 240>}, {pipeline_mode = #tpu.pipeline_mode<synchronous>, transform_indices = @transform_3, window_bounds = array<i64: 80, 80>}, {pipeline_mode = #tpu.pipeline_mode<synchronous>, transform_indices = @transform_4, window_bounds = array<i64: 80, 256>}, {pipeline_mode = #tpu.pipeline_mode<synchronous>, transform_indices = @transform_5, window_bounds = array<i64: 256, 80>}, {pipeline_mode = #tpu.pipeline_mode<synchronous>, transform_indices = @transform_6, window_bounds = array<i64: 80, 128>}, {pipeline_mode = #tpu.pipeline_mode<synchronous>, transform_indices = @transform_7, window_bounds = array<i64: 16, 256>}, {transform_indices = @transform_8, window_bounds = array<i64: 2, 128>}]} {
    %c0 = arith.constant 0 : index
    %c0_0 = arith.constant 0 : index
    %0 = vector.load %arg8[%c0, %c0_0] : memref<16x256xf32, #tpu.memory_space<vmem>>, vector<1x80xf32>
    %c1 = arith.constant 1 : index
    %c0_1 = arith.constant 0 : index
    %1 = vector.load %arg8[%c1, %c0_1] : memref<16x256xf32, #tpu.memory_space<vmem>>, vector<1x240xf32>
    %c2 = arith.constant 2 : index
    %c0_2 = arith.constant 0 : index
    %2 = vector.load %arg8[%c2, %c0_2] : memref<16x256xf32, #tpu.memory_space<vmem>>, vector<1x80xf32>
    %c3 = arith.constant 3 : index
    %c0_3 = arith.constant 0 : index
    %3 = vector.load %arg8[%c3, %c0_3] : memref<16x256xf32, #tpu.memory_space<vmem>>, vector<1x256xf32>
    %c4 = arith.constant 4 : index
    %c0_4 = arith.constant 0 : index
    %4 = vector.load %arg8[%c4, %c0_4] : memref<16x256xf32, #tpu.memory_space<vmem>>, vector<1x80xf32>
    %c5 = arith.constant 5 : index
    %c0_5 = arith.constant 0 : index
    %5 = vector.load %arg8[%c5, %c0_5] : memref<16x256xf32, #tpu.memory_space<vmem>>, vector<1x128xf32>
    %c6 = arith.constant 6 : index
    %c0_6 = arith.constant 0 : index
    %6 = vector.load %arg8[%c6, %c0_6] : memref<16x256xf32, #tpu.memory_space<vmem>>, vector<1x80xf32>
    %c7 = arith.constant 7 : index
    %c0_7 = arith.constant 0 : index
    %7 = vector.load %arg8[%c7, %c0_7] : memref<16x256xf32, #tpu.memory_space<vmem>>, vector<1x80xf32>
    %c8 = arith.constant 8 : index
    %c0_8 = arith.constant 0 : index
    %8 = vector.load %arg8[%c8, %c0_8] : memref<16x256xf32, #tpu.memory_space<vmem>>, vector<1x80xf32>
    %c9 = arith.constant 9 : index
    %c0_9 = arith.constant 0 : index
    %9 = vector.load %arg8[%c9, %c0_9] : memref<16x256xf32, #tpu.memory_space<vmem>>, vector<1x80xf32>
    %c0_10 = arith.constant 0 : index
    %c0_11 = arith.constant 0 : index
    %c0_12 = arith.constant 0 : index
    %10 = vector.load %arg1[%c0_10, %c0_11, %c0_12] : memref<2x8x40xf32, #tpu.memory_space<vmem>>, vector<2x8x40xf32>
    %11 = vector.shape_cast %10 : vector<2x8x40xf32> to vector<16x40xf32>
    %12 = arith.truncf %11 : vector<16x40xf32> to vector<16x40xbf16>
    %c0_13 = arith.constant 0 : index
    %c0_14 = arith.constant 0 : index
    %13 = vector.load %arg2[%c0_13, %c0_14] : memref<40x80xbf16, #tpu.memory_space<vmem>>, vector<40x80xbf16>
    %cst = arith.constant dense<0.000000e+00> : vector<16x80xf32>
    %14 = tpu.matmul %12, %13, %cst {dimension_numbers = #tpu.dot_dimension_numbers<[1], [0], [0], [1], [0, 0, 1, 1], [], []>} : vector<16x40xbf16>, vector<40x80xbf16>, vector<16x80xf32> -> vector<16x80xf32>
    %15 = vector.broadcast %0 : vector<1x80xf32> to vector<16x80xf32>
    %16 = arith.addf %14, %15 : vector<16x80xf32>
    %cst_15 = arith.constant dense<0.000000e+00> : vector<16xf32>
    %17 = vector.multi_reduction <add>, %16, %cst_15 [1] : vector<16x80xf32> to vector<16xf32>
    %18 = vector.shape_cast %17 : vector<16xf32> to vector<16x1xf32>
    %cst_16 = arith.constant 8.000000e+01 : f32
    %19 = vector.broadcast %cst_16 : f32 to vector<16x1xf32>
    %20 = arith.divf %18, %19 : vector<16x1xf32>
    %21 = vector.broadcast %20 : vector<16x1xf32> to vector<16x80xf32>
    %22 = arith.subf %16, %21 : vector<16x80xf32>
    %23 = arith.mulf %22, %22 : vector<16x80xf32>
    %cst_17 = arith.constant dense<0.000000e+00> : vector<16xf32>
    %24 = vector.multi_reduction <add>, %23, %cst_17 [1] : vector<16x80xf32> to vector<16xf32>
    %25 = vector.shape_cast %24 : vector<16xf32> to vector<16x1xf32>
    %cst_18 = arith.constant 8.000000e+01 : f32
    %26 = vector.broadcast %cst_18 : f32 to vector<16x1xf32>
    %27 = arith.divf %25, %26 : vector<16x1xf32>
    %28 = vector.broadcast %20 : vector<16x1xf32> to vector<16x80xf32>
    %29 = arith.subf %16, %28 : vector<16x80xf32>
    %cst_19 = arith.constant 9.99999974E-6 : f32
    %30 = vector.broadcast %cst_19 : f32 to vector<16x1xf32>
    %31 = arith.addf %27, %30 : vector<16x1xf32>
    %32 = math.rsqrt %31 : vector<16x1xf32>
    %33 = vector.broadcast %32 : vector<16x1xf32> to vector<16x80xf32>
    %34 = arith.mulf %29, %33 : vector<16x80xf32>
    %35 = vector.broadcast %6 : vector<1x80xf32> to vector<16x80xf32>
    %36 = arith.mulf %34, %35 : vector<16x80xf32>
    %37 = vector.broadcast %7 : vector<1x80xf32> to vector<16x80xf32>
    %38 = arith.addf %36, %37 : vector<16x80xf32>
    %39 = arith.truncf %38 : vector<16x80xf32> to vector<16x80xbf16>
    %c0_20 = arith.constant 0 : index
    %c0_21 = arith.constant 0 : index
    %40 = vector.load %arg3[%c0_20, %c0_21] : memref<80x240xbf16, #tpu.memory_space<vmem>>, vector<80x240xbf16>
    %cst_22 = arith.constant dense<0.000000e+00> : vector<16x240xf32>
    %41 = tpu.matmul %39, %40, %cst_22 {dimension_numbers = #tpu.dot_dimension_numbers<[1], [0], [0], [1], [0, 0, 1, 1], [], []>} : vector<16x80xbf16>, vector<80x240xbf16>, vector<16x240xf32> -> vector<16x240xf32>
    %42 = vector.broadcast %1 : vector<1x240xf32> to vector<16x240xf32>
    %43 = arith.addf %41, %42 : vector<16x240xf32>
    %44 = vector.shape_cast %43 : vector<16x240xf32> to vector<2x8x240xf32>
    %45 = vector.extract_strided_slice %44 {offsets = [0, 0, 0], sizes = [2, 8, 80], strides = [1, 1, 1]} : vector<2x8x240xf32> to vector<2x8x80xf32>
    %cst_23 = arith.constant 0.158113882 : f32
    %46 = vector.broadcast %cst_23 : f32 to vector<2x8x80xf32>
    %47 = arith.mulf %45, %46 : vector<2x8x80xf32>
    %48 = vector.extract_strided_slice %44 {offsets = [0, 0, 80], sizes = [2, 8, 80], strides = [1, 1, 1]} : vector<2x8x240xf32> to vector<2x8x80xf32>
    %49 = vector.extract_strided_slice %44 {offsets = [0, 0, 160], sizes = [2, 8, 80], strides = [1, 1, 1]} : vector<2x8x240xf32> to vector<2x8x80xf32>
    %50 = vector.extract_strided_slice %47 {offsets = [0, 0, 0], sizes = [2, 8, 40], strides = [1, 1, 1]} : vector<2x8x80xf32> to vector<2x8x40xf32>
    %51 = arith.truncf %50 : vector<2x8x40xf32> to vector<2x8x40xbf16>
    %52 = vector.extract_strided_slice %48 {offsets = [0, 0, 0], sizes = [2, 8, 40], strides = [1, 1, 1]} : vector<2x8x80xf32> to vector<2x8x40xf32>
    %53 = arith.truncf %52 : vector<2x8x40xf32> to vector<2x8x40xbf16>
    %54 = vector.extract_strided_slice %49 {offsets = [0, 0, 0], sizes = [2, 8, 40], strides = [1, 1, 1]} : vector<2x8x80xf32> to vector<2x8x40xf32>
    %55 = arith.truncf %54 : vector<2x8x40xf32> to vector<2x8x40xbf16>
    %cst_24 = arith.constant dense<0.000000e+00> : vector<2x8x8xf32>
    %56 = tpu.matmul %51, %53, %cst_24 {dimension_numbers = #tpu.dot_dimension_numbers<[2], [2], [1], [1], [0, 0, 0, 1, 1, 1], [0], [0]>} : vector<2x8x40xbf16>, vector<2x8x40xbf16>, vector<2x8x8xf32> -> vector<2x8x8xf32>
    %cst_25 = arith.constant dense<0xFF800000> : vector<2x8xf32>
    %57 = vector.multi_reduction <maximumf>, %56, %cst_25 [2] : vector<2x8x8xf32> to vector<2x8xf32>
    %58 = vector.shape_cast %57 : vector<2x8xf32> to vector<2x8x1xf32>
    %59 = vector.broadcast %58 : vector<2x8x1xf32> to vector<2x8x8xf32>
    %60 = arith.subf %56, %59 : vector<2x8x8xf32>
    %61 = math.exp %60 : vector<2x8x8xf32>
    %cst_26 = arith.constant dense<0.000000e+00> : vector<2x8xf32>
    %62 = vector.multi_reduction <add>, %61, %cst_26 [2] : vector<2x8x8xf32> to vector<2x8xf32>
    %63 = vector.shape_cast %62 : vector<2x8xf32> to vector<2x8x1xf32>
    %64 = tpu.reciprocal %63 {approx = true} : vector<2x8x1xf32> -> vector<2x8x1xf32>
    %65 = vector.broadcast %64 : vector<2x8x1xf32> to vector<2x8x8xf32>
    %66 = arith.mulf %61, %65 : vector<2x8x8xf32>
    %67 = arith.truncf %66 : vector<2x8x8xf32> to vector<2x8x8xbf16>
    %cst_27 = arith.constant dense<0.000000e+00> : vector<2x8x40xf32>
    %68 = tpu.matmul %67, %55, %cst_27 {dimension_numbers = #tpu.dot_dimension_numbers<[2], [1], [1], [2], [0, 0, 0, 1, 1, 2], [0], [0]>} : vector<2x8x8xbf16>, vector<2x8x40xbf16>, vector<2x8x40xf32> -> vector<2x8x40xf32>
    %69 = vector.extract_strided_slice %47 {offsets = [0, 0, 40], sizes = [2, 8, 40], strides = [1, 1, 1]} : vector<2x8x80xf32> to vector<2x8x40xf32>
    %70 = arith.truncf %69 : vector<2x8x40xf32> to vector<2x8x40xbf16>
    %71 = vector.extract_strided_slice %48 {offsets = [0, 0, 40], sizes = [2, 8, 40], strides = [1, 1, 1]} : vector<2x8x80xf32> to vector<2x8x40xf32>
    %72 = arith.truncf %71 : vector<2x8x40xf32> to vector<2x8x40xbf16>
    %73 = vector.extract_strided_slice %49 {offsets = [0, 0, 40], sizes = [2, 8, 40], strides = [1, 1, 1]} : vector<2x8x80xf32> to vector<2x8x40xf32>
    %74 = arith.truncf %73 : vector<2x8x40xf32> to vector<2x8x40xbf16>
    %cst_28 = arith.constant dense<0.000000e+00> : vector<2x8x8xf32>
    %75 = tpu.matmul %70, %72, %cst_28 {dimension_numbers = #tpu.dot_dimension_numbers<[2], [2], [1], [1], [0, 0, 0, 1, 1, 1], [0], [0]>} : vector<2x8x40xbf16>, vector<2x8x40xbf16>, vector<2x8x8xf32> -> vector<2x8x8xf32>
    %cst_29 = arith.constant dense<0xFF800000> : vector<2x8xf32>
    %76 = vector.multi_reduction <maximumf>, %75, %cst_29 [2] : vector<2x8x8xf32> to vector<2x8xf32>
    %77 = vector.shape_cast %76 : vector<2x8xf32> to vector<2x8x1xf32>
    %78 = vector.broadcast %77 : vector<2x8x1xf32> to vector<2x8x8xf32>
    %79 = arith.subf %75, %78 : vector<2x8x8xf32>
    %80 = math.exp %79 : vector<2x8x8xf32>
    %cst_30 = arith.constant dense<0.000000e+00> : vector<2x8xf32>
    %81 = vector.multi_reduction <add>, %80, %cst_30 [2] : vector<2x8x8xf32> to vector<2x8xf32>
    %82 = vector.shape_cast %81 : vector<2x8xf32> to vector<2x8x1xf32>
    %83 = tpu.reciprocal %82 {approx = true} : vector<2x8x1xf32> -> vector<2x8x1xf32>
    %84 = vector.broadcast %83 : vector<2x8x1xf32> to vector<2x8x8xf32>
    %85 = arith.mulf %80, %84 : vector<2x8x8xf32>
    %86 = arith.truncf %85 : vector<2x8x8xf32> to vector<2x8x8xbf16>
    %cst_31 = arith.constant dense<0.000000e+00> : vector<2x8x40xf32>
    %87 = tpu.matmul %86, %74, %cst_31 {dimension_numbers = #tpu.dot_dimension_numbers<[2], [1], [1], [2], [0, 0, 0, 1, 1, 2], [0], [0]>} : vector<2x8x8xbf16>, vector<2x8x40xbf16>, vector<2x8x40xf32> -> vector<2x8x40xf32>
    %88 = tpu.concatenate %68, %87 in 2 : vector<2x8x40xf32>, vector<2x8x40xf32> -> vector<2x8x80xf32>
    %89 = vector.shape_cast %88 : vector<2x8x80xf32> to vector<16x80xf32>
    %90 = arith.truncf %89 : vector<16x80xf32> to vector<16x80xbf16>
    %c0_32 = arith.constant 0 : index
    %c0_33 = arith.constant 0 : index
    %91 = vector.load %arg4[%c0_32, %c0_33] : memref<80x80xbf16, #tpu.memory_space<vmem>>, vector<80x80xbf16>
    %cst_34 = arith.constant dense<0.000000e+00> : vector<16x80xf32>
    %92 = tpu.matmul %90, %91, %cst_34 {dimension_numbers = #tpu.dot_dimension_numbers<[1], [0], [0], [1], [0, 0, 1, 1], [], []>} : vector<16x80xbf16>, vector<80x80xbf16>, vector<16x80xf32> -> vector<16x80xf32>
    %93 = vector.broadcast %2 : vector<1x80xf32> to vector<16x80xf32>
    %94 = arith.addf %92, %93 : vector<16x80xf32>
    %95 = arith.addf %16, %94 : vector<16x80xf32>
    %cst_35 = arith.constant dense<0.000000e+00> : vector<16xf32>
    %96 = vector.multi_reduction <add>, %95, %cst_35 [1] : vector<16x80xf32> to vector<16xf32>
    %97 = vector.shape_cast %96 : vector<16xf32> to vector<16x1xf32>
    %cst_36 = arith.constant 8.000000e+01 : f32
    %98 = vector.broadcast %cst_36 : f32 to vector<16x1xf32>
    %99 = arith.divf %97, %98 : vector<16x1xf32>
    %100 = vector.broadcast %99 : vector<16x1xf32> to vector<16x80xf32>
    %101 = arith.subf %95, %100 : vector<16x80xf32>
    %102 = arith.mulf %101, %101 : vector<16x80xf32>
    %cst_37 = arith.constant dense<0.000000e+00> : vector<16xf32>
    %103 = vector.multi_reduction <add>, %102, %cst_37 [1] : vector<16x80xf32> to vector<16xf32>
    %104 = vector.shape_cast %103 : vector<16xf32> to vector<16x1xf32>
    %cst_38 = arith.constant 8.000000e+01 : f32
    %105 = vector.broadcast %cst_38 : f32 to vector<16x1xf32>
    %106 = arith.divf %104, %105 : vector<16x1xf32>
    %107 = vector.broadcast %99 : vector<16x1xf32> to vector<16x80xf32>
    %108 = arith.subf %95, %107 : vector<16x80xf32>
    %cst_39 = arith.constant 9.99999974E-6 : f32
    %109 = vector.broadcast %cst_39 : f32 to vector<16x1xf32>
    %110 = arith.addf %106, %109 : vector<16x1xf32>
    %111 = math.rsqrt %110 : vector<16x1xf32>
    %112 = vector.broadcast %111 : vector<16x1xf32> to vector<16x80xf32>
    %113 = arith.mulf %108, %112 : vector<16x80xf32>
    %114 = vector.broadcast %8 : vector<1x80xf32> to vector<16x80xf32>
    %115 = arith.mulf %113, %114 : vector<16x80xf32>
    %116 = vector.broadcast %9 : vector<1x80xf32> to vector<16x80xf32>
    %117 = arith.addf %115, %116 : vector<16x80xf32>
    %118 = arith.truncf %117 : vector<16x80xf32> to vector<16x80xbf16>
    %c0_40 = arith.constant 0 : index
    %c0_41 = arith.constant 0 : index
    %119 = vector.load %arg5[%c0_40, %c0_41] : memref<80x256xbf16, #tpu.memory_space<vmem>>, vector<80x256xbf16>
    %cst_42 = arith.constant dense<0.000000e+00> : vector<16x256xf32>
    %120 = tpu.matmul %118, %119, %cst_42 {dimension_numbers = #tpu.dot_dimension_numbers<[1], [0], [0], [1], [0, 0, 1, 1], [], []>} : vector<16x80xbf16>, vector<80x256xbf16>, vector<16x256xf32> -> vector<16x256xf32>
    %121 = vector.broadcast %3 : vector<1x256xf32> to vector<16x256xf32>
    %122 = arith.addf %120, %121 : vector<16x256xf32>
    %cst_43 = arith.constant 0.000000e+00 : f32
    %123 = vector.broadcast %cst_43 : f32 to vector<16x256xf32>
    %124 = arith.maximumf %122, %123 : vector<16x256xf32>
    %125 = arith.truncf %124 : vector<16x256xf32> to vector<16x256xbf16>
    %c0_44 = arith.constant 0 : index
    %c0_45 = arith.constant 0 : index
    %126 = vector.load %arg6[%c0_44, %c0_45] : memref<256x80xbf16, #tpu.memory_space<vmem>>, vector<256x80xbf16>
    %cst_46 = arith.constant dense<0.000000e+00> : vector<16x80xf32>
    %127 = tpu.matmul %125, %126, %cst_46 {dimension_numbers = #tpu.dot_dimension_numbers<[1], [0], [0], [1], [0, 0, 1, 1], [], []>} : vector<16x256xbf16>, vector<256x80xbf16>, vector<16x80xf32> -> vector<16x80xf32>
    %128 = vector.broadcast %4 : vector<1x80xf32> to vector<16x80xf32>
    %129 = arith.addf %127, %128 : vector<16x80xf32>
    %130 = arith.addf %95, %129 : vector<16x80xf32>
    %131 = vector.shape_cast %130 : vector<16x80xf32> to vector<2x8x80xf32>
    %cst_47 = arith.constant dense<0.000000e+00> : vector<2x80xf32>
    %132 = vector.multi_reduction <add>, %131, %cst_47 [1] : vector<2x8x80xf32> to vector<2x80xf32>
    %cst_48 = arith.constant 8.000000e+00 : f32
    %133 = vector.broadcast %cst_48 : f32 to vector<2x80xf32>
    %134 = arith.divf %132, %133 : vector<2x80xf32>
    %135 = arith.truncf %134 : vector<2x80xf32> to vector<2x80xbf16>
    %c0_49 = arith.constant 0 : index
    %c0_50 = arith.constant 0 : index
    %136 = vector.load %arg7[%c0_49, %c0_50] : memref<80x128xbf16, #tpu.memory_space<vmem>>, vector<80x128xbf16>
    %cst_51 = arith.constant dense<0.000000e+00> : vector<2x128xf32>
    %137 = tpu.matmul %135, %136, %cst_51 {dimension_numbers = #tpu.dot_dimension_numbers<[1], [0], [0], [1], [0, 0, 1, 1], [], []>} : vector<2x80xbf16>, vector<80x128xbf16>, vector<2x128xf32> -> vector<2x128xf32>
    %138 = vector.broadcast %5 : vector<1x128xf32> to vector<2x128xf32>
    %139 = arith.addf %137, %138 : vector<2x128xf32>
    %c0_52 = arith.constant 0 : index
    %c0_53 = arith.constant 0 : index
    %140 = vector.load %arg9[%c0_52, %c0_53] : memref<2x128xf32, #tpu.memory_space<vmem>>, vector<2x128xf32>
    tpu.vector_store %arg9[%c0_52, %c0_53], %139 {strides = array<i32>} : memref<2x128xf32, #tpu.memory_space<vmem>>, vector<2x128xf32>,
    return
  }
  func.func @transform_0(%arg0: i32) -> (i32, i32, i32) {
    %c0_i32 = arith.constant 0 : i32
    %c0_i32_0 = arith.constant 0 : i32
    %c0_i32_1 = arith.constant 0 : i32
    return %arg0, %c0_i32, %c0_i32_0 : i32, i32, i32
  }
  func.func @transform_1(%arg0: i32) -> (i32, i32) {
    %c0_i32 = arith.constant 0 : i32
    %c0_i32_0 = arith.constant 0 : i32
    %c0_i32_1 = arith.constant 0 : i32
    return %c0_i32, %c0_i32_0 : i32, i32
  }
  func.func @transform_2(%arg0: i32) -> (i32, i32) {
    %c0_i32 = arith.constant 0 : i32
    %c0_i32_0 = arith.constant 0 : i32
    %c0_i32_1 = arith.constant 0 : i32
    return %c0_i32, %c0_i32_0 : i32, i32
  }
  func.func @transform_3(%arg0: i32) -> (i32, i32) {
    %c0_i32 = arith.constant 0 : i32
    %c0_i32_0 = arith.constant 0 : i32
    %c0_i32_1 = arith.constant 0 : i32
    return %c0_i32, %c0_i32_0 : i32, i32
  }
  func.func @transform_4(%arg0: i32) -> (i32, i32) {
    %c0_i32 = arith.constant 0 : i32
    %c0_i32_0 = arith.constant 0 : i32
    %c0_i32_1 = arith.constant 0 : i32
    return %c0_i32, %c0_i32_0 : i32, i32
  }
  func.func @transform_5(%arg0: i32) -> (i32, i32) {
    %c0_i32 = arith.constant 0 : i32
    %c0_i32_0 = arith.constant 0 : i32
    %c0_i32_1 = arith.constant 0 : i32
    return %c0_i32, %c0_i32_0 : i32, i32
  }
  func.func @transform_6(%arg0: i32) -> (i32, i32) {
    %c0_i32 = arith.constant 0 : i32
    %c0_i32_0 = arith.constant 0 : i32
    %c0_i32_1 = arith.constant 0 : i32
    return %c0_i32, %c0_i32_0 : i32, i32
  }
  func.func @transform_7(%arg0: i32) -> (i32, i32) {
    %c0_i32 = arith.constant 0 : i32
    %c0_i32_0 = arith.constant 0 : i32
    %c0_i32_1 = arith.constant 0 : i32
    return %c0_i32, %c0_i32_0 : i32, i32
  }
  func.func @transform_8(%arg0: i32) -> (i32, i32) {
    %c0_i32 = arith.constant 0 : i32
    %c0_i32_0 = arith.constant 0 : i32
    return %arg0, %c0_i32 : i32, i32
  }
}

</mosaic_0001>

<bundles_post_ra>
// kernel: tpu_custom_call.1
= control target key start
LH: loop header
LB: loop body
LE: loop exit
PB: predicated region body
PF: predicated region fallthrough
CT: control target
= control target key end

     0   :  { %13 = vsyncpa [#allocation3], 0  ;;  %s2098_s0 = inlined_call_operand.hbm [shape: f32[2,8,40], index: 0, kind: input, shape index: {}]   ;;  %s2099_s1 = inlined_call_operand.hbm [shape: bf16[40,80], index: 1, kind: input, shape index: {}]   ;;  %s2100_s2 = inlined_call_operand.vmem [shape: bf16[80,240], index: 2, kind: input, shape index: {}]   ;;  %s2101_s3 = inlined_call_operand.vmem [shape: bf16[80,80], index: 3, kind: input, shape index: {}]   ;;  %s2102_s4 = inlined_call_operand.vmem [shape: bf16[80,256], index: 4, kind: input, shape index: {}]   ;;  %s2103_s5 = inlined_call_operand.vmem [shape: bf16[256,80], index: 5, kind: input, shape index: {}]   ;;  %s2104_s6 = inlined_call_operand.hbm [shape: bf16[80,128], index: 6, kind: input, shape index: {}]   ;;  %s2105_s7 = inlined_call_operand.hbm [shape: f32[16,256], index: 7, kind: input, shape index: {}]   ;;  %s2106_s8 = inlined_call_operand.hbm [shape: f32[2,128], index: 8, kind: output, shape index: {}]  }
   0x1   :  { %14 = vsyncpa [#allocation6], 0 }
   0x2   :  { %15 = vsyncpa [#allocation9], 0 }
   0x3   :  { %16 = vsyncpa [#allocation4], 0  ;;  %s1744_s27 = smov [#allocation5]  }
   0x4   :  { %s34_s28 = sshll.u32 %s1744_s27, 4  ;;  %s35_s28 = int_to_ptr.vmem [resolvable:$true] %s34_s28 }
   0x5   :  { %s1644_s29 = scalar_lea.vmem %s35_s28, 320  ;;  %p1649_p1 = scmp.lt.s32.totalorder %s35_s28, %s35_s28 }
   0x6   :  { %p1645_p0 = scmp.ne.s32.totalorder %s35_s28, %s1644_s29  ;;  %p1650_p2 = scmp.lt.s32.totalorder %s1644_s29, %s1644_s29 }
   0x8   :  { %p1651_p3 = por %p1650_p2, %p1649_p1 }
   0xa   :  { %p1652_p4 = pnand %p1651_p3, %p1645_p0 }
   0xc   :  { %1655 = shalt.err (!%p1652_p4)
}
   0xd   :  { %s1745_s30 = smov 64   ;;  %s1746_s9 = smov 4  }
   0xe   :  { %40 = dma.hbm_to_vmem [thread:$0]  %s2099_s1, 320, %s35_s28, [#allocation6], %s1745_s30, %s1745_s30, %s1746_s9  }
   0xf   :  { %s1747_s12 = smov [#allocation2]  }
  0x10   :  { %s22_s13 = sshll.u32 %s1747_s12, 4  ;;  %s23_s13 = int_to_ptr.vmem [resolvable:$true] %s22_s13 }
  0x11   :  { %s1664_s14 = scalar_lea.vmem %s23_s13, 256  ;;  %p1669_p6 = scmp.lt.s32.totalorder %s23_s13, %s23_s13 }
  0x12   :  { %p1665_p5 = scmp.ne.s32.totalorder %s23_s13, %s1664_s14  ;;  %p1670_p7 = scmp.lt.s32.totalorder %s1664_s14, %s1664_s14 }
  0x14   :  { %p1671_p8 = por %p1670_p7, %p1669_p6 }
  0x16   :  { %p1672_p9 = pnand %p1671_p8, %p1665_p5 }
  0x18   :  { %1675 = shalt.err (!%p1672_p9)
}
  0x19   :  { %s1748_s15 = smov 128   ;;  %s1749_s16 = smov 8  }
  0x1a   :  { %28 = dma.hbm_to_vmem [thread:$0]  %s2098_s0, 256, %s23_s13, [#allocation3], %s1748_s15, %s1748_s15, %s1749_s16  }
  0x1b   :  { %s1750_s19 = smov [#allocation7]   ;;  %s1751_s1 = smov [#allocation8]  }
  0x1c   :  { %s54_s20 = sshll.u32 %s1750_s19, 4  ;;  %s66_s21 = sshll.u32 %s1751_s1, 4  ;;  %s55_s20 = int_to_ptr.vmem [resolvable:$true] %s54_s20  ;;  %s67_s21 = int_to_ptr.vmem [resolvable:$true] %s66_s21 }
  0x1d   :  { %s1684_s22 = scalar_lea.vmem %s55_s20, 640  ;;  %p1689_p11 = scmp.lt.s32.totalorder %s55_s20, %s55_s20 }
  0x1e   :  { %p1685_p10 = scmp.ne.s32.totalorder %s55_s20, %s1684_s22  ;;  %p1690_p12 = scmp.lt.s32.totalorder %s1684_s22, %s1684_s22 }
  0x20   :  { %p1691_p13 = por %p1690_p12, %p1689_p11 }
  0x22   :  { %p1692_p0 = pnand %p1691_p13, %p1685_p10 }
  0x24   :  { %1695 = shalt.err (!%p1692_p0)
}
  0x25   :  { %60 = dma.hbm_to_vmem [thread:$0]  %s2104_s6, 640, %s55_s20, [#allocation6], %s1745_s30, %s1745_s30, %s1746_s9  }
  0x26   :  { %s1704_s0 = scalar_lea.vmem %s67_s21, 512  ;;  %p1709_p2 = scmp.lt.s32.totalorder %s67_s21, %s67_s21 }
  0x27   :  { %p1705_p1 = scmp.ne.s32.totalorder %s67_s21, %s1704_s0  ;;  %p1710_p3 = scmp.lt.s32.totalorder %s1704_s0, %s1704_s0 }
  0x29   :  { %p1711_p4 = por %p1710_p3, %p1709_p2 }
  0x2b   :  { %p1712_p5 = pnand %p1711_p4, %p1705_p1 }
  0x2d   :  { %1715 = shalt.err (!%p1712_p5)
}
  0x2e   :  { %s1752_s25 = smov 256   ;;  %s1753_s26 = smov 16  }
  0x2f   :  { %72 = dma.hbm_to_vmem [thread:$0]  %s2105_s7, 512, %s67_s21, [#allocation9], %s1752_s25, %s1752_s25, %s1753_s26  }
  0x30   :  { %1736 = dma.done.wait [#allocation3], 256  }
  0x31   :  { %1737 = vsyncadd [#allocation3], 4294967040 }
  0x32   :  { %1738 = dma.done.wait [#allocation6], 960  }
  0x33   :  { %1739 = vsyncadd [#allocation6], 4294966336 }
  0x34   :  { %1740 = dma.done.wait [#allocation9], 512  }
  0x35   :  { %1741 = vsyncadd [#allocation9], 4294966784  ;;  %v1754_v0 = vmov 0.0   ;;  %vm1755_vm0 = vmmov 0   ;;  %vm125_vm1 = vcmask 1043456   ;;  %v1554_v3 = vld [vmem:[#allocation5 + $0x8] sm:$0xff]   ;;  %v214_v55 = vlaneseq }
  0x36   :  { %1443 = vmatprep.subr.bf16.mxu0 %v1754_v0  ;;  %1449 = vmatprep.mubr.msk.bf16.mxu0 %vm1755_vm0, %v1754_v0  ;;  %v1553_v1 = vld [vmem:[#allocation5 + $0x10] ss:$0 sps:$4 sm:$0xff]   ;;  %v1555_v4 = vld [vmem:[#allocation5] sm:$0xff]   ;;  %v99_v6 = vld [vmem:[#allocation2 + $0x8] sm:$0xff]  ;;  %vm121_vm2 = vcmask 326656   ;;  %vm170_vm3 = vcmask 654336  }
  0x37   :  { %v127_v2 = vsel %vm125_vm1, %v1553_v1, 0  ;;  %v98_v5 = vld [vmem:[#allocation2] sm:$0xff]  ;;  %v86_v8 = vld [vmem:[#allocation8] ss:$0 sm:$0xff]  ;;  %v1559_v29 = vld [vmem:[%s2100_s2 + $0x34] ss:$8 sps:$4 sm:$0xff]  }
  0x38   :  { %1444 = vmatpush3.bf16.msra.mxu0 %v127_v2  ;;  %v100_v7 = vpack.c.bf16 %v99_v6, %v98_v5  ;;  %v1556_v27 = vld [vmem:[%s2100_s2 + $0x44] ss:$8 sps:$4 sm:$0xff]   ;;  %v1558_v28 = vld [vmem:[%s2100_s2 + $0x40] ss:$8 sps:$4 sm:$0xff]   ;;  %v1561_v30 = vld [vmem:[%s2100_s2 + $0x30] ss:$8 sps:$4 sm:$0xff]  }
  0x39   :  { %1445 = vmatprep.subr.bf16.mxu0 %v1754_v0  ;;  %283 = vmatprep.subr.bf16.mxu1 %v1556_v27  ;;  %v1562_v31 = vld [vmem:[%s2100_s2 + $0x24] ss:$8 sps:$4 sm:$0xff]   ;;  %v1756_v32 = vmov 0   ;;  %v1564_v33 = vld [vmem:[%s2100_s2 + $0x20] ss:$8 sps:$4 sm:$0xff]   ;;  %v1884_v56 = vshrl.u32 %v214_v55, 7 }
  0x3a   :  { %284 = vmatpush1.bf16.msra.mxu1 %v1558_v28  ;;  %309 = vmatprep.mubr.bf16.mxu1 %v1756_v32  ;;  %v1565_v34 = vld [vmem:[%s2100_s2 + $0x14] ss:$8 sps:$4 sm:$0xff]   ;;  %v1567_v35 = vld [vmem:[%s2100_s2 + $0x10] ss:$8 sps:$4 sm:$0xff]   ;;  %v1568_v36 = vld [vmem:[%s2100_s2 + $0x4] ss:$8 sps:$4 sm:$0xff]  }
  0x3b   :  { %285 = vmatprep.subr.bf16.mxu1 %v1559_v29  ;;  %v1570_v37 = vld [vmem:[%s2100_s2] ss:$8 sps:$4 sm:$0xff]   ;;  %v94_v46 = vld [vmem:[#allocation8 + $0x6] ss:$0 sm:$0xff]  ;;  %v95_v50 = vld [vmem:[#allocation8 + $0x7] ss:$0 sm:$0xff] }
  0x3c   :  { %1446 = vmatpush3.bf16.msra.mxu0 %v1554_v3  ;;  %v216_v57 = vsub.s32 0, %v1884_v56  ;;  %v88_v58 = vld [vmem:[#allocation8 + $0x1] ss:$8 sm:$0x3]  ;;  %s1757_s2 = smov 48   ;;  %vm426_vm4 = vcmask 64512  }
  0x3d   :  { %1447 = vmatprep.subr.bf16.mxu0 %v1754_v0  ;;  %s1758_s0 = smov 96   ;;  %s1759_s25 = smov 88   ;;  %vm1233_vm5 = vcmask 1041409  }
  0x3e   :  { %286 = vmatpush1.bf16.msra.mxu1 %v1561_v30  ;;  %v217_v59 = vrot.slane %v88_v58, %v216_v57  ;;  %s1761_s12 = smov 40  }
  0x3f   :  { %287 = vmatprep.subr.bf16.mxu1 %v1562_v31 }
  0x40   :  { %1448 = vmatpush3.bf16.msra.mxu0 %v1555_v4 }
  0x41   :  { %1453 = vmatprep.subr.bf16.mxu0 %v1754_v0 }
  0x42   :  { %288 = vmatpush1.bf16.msra.mxu1 %v1564_v33 }
  0x43   :  { %1450 = vmatmul.mubr.msk.bf16.vlgmr.msra.gmra.mxu0 %vm121_vm2, %v100_v7  ;;  %289 = vmatprep.subr.bf16.mxu1 %v1565_v34 }
  0x44   :  { %1455 = vmatprep.mubr.msk.bf16.mxu0 %vm1755_vm0, %v1754_v0 }
  0x46   :  { %290 = vmatpush1.bf16.msra.mxu1 %v1567_v35 }
  0x47   :  { %291 = vmatprep.subr.bf16.mxu1 %v1568_v36 }
  0x4a   :  { %292 = vmatpush1.bf16.msra.mxu1 %v1570_v37 }
  0x4b   :  { %1465 = vmatprep.subr.bf16.mxu1 %v1754_v0 }
 0x103   :  { %v163_v9 = vpop.f32.mrf.mxu0 }
 0x104   :  { %v1837_v10 = vadd.f32 %v163_v9, %v86_v8 }
 0x105   :  { %v1451_v11 = vpop.f32.mrf.mxu0 }
 0x106   :  { %v171_v12 = vsel %vm170_vm3, %v1837_v10, 0.0 }
 0x107   :  { %v166_v13 = vpop.f32.mrf.mxu0  ;;  %172 = vadd.xlane.f32.xlu0 %v171_v12 }
 0x108   :  { %v1841_v14 = vadd.f32 %v166_v13, %v86_v8 }
 0x109   :  { %v1452_v15 = vpop.f32.mrf.mxu0 }
 0x10a   :  { %v174_v16 = vsel %vm170_vm3, %v1841_v14, 0.0 }
 0x10b   :  { %175 = vadd.xlane.f32.xlu0 %v174_v16 }
 0x190   :  { %v173_v17 = vpop.xlane.xlu0 %172 }
 0x191   :  { %v178_v18 = vmul.f32 0.0125, %v173_v17 }
 0x193   :  { %v180_v19 = vsub.f32 %v1837_v10, %v178_v18 }
 0x194   :  { %v176_v20 = vpop.xlane.xlu0 %175 }
 0x195   :  { %v179_v21 = vmul.f32 0.0125, %v176_v20  ;;  %v182_v22 = vmul.f32 %v180_v19, %v180_v19 }
 0x197   :  { %v181_v23 = vsub.f32 %v1841_v14, %v179_v21  ;;  %v184_v24 = vsel %vm170_vm3, %v182_v22, 0.0 }
 0x198   :  { %185 = vadd.xlane.f32.xlu1 %v184_v24 }
 0x199   :  { %v183_v25 = vmul.f32 %v181_v23, %v181_v23 }
 0x19b   :  { %v187_v26 = vsel %vm170_vm3, %v183_v25, 0.0 }
 0x19c   :  { %188 = vadd.xlane.f32.xlu1 %v187_v26 }
 0x221   :  { %v186_v38 = vpop.xlane.xlu1 %185 }
 0x222   :  { %v190_v39 = vmul.f32 0.0125, %v186_v38 }
 0x224   :  { %v192_v40 = vadd.f32 1e-05, %v190_v39 }
 0x225   :  { %v189_v41 = vpop.xlane.xlu1 %188 }
 0x226   :  { %1612 = vrsqrt.f32 %v192_v40  ;;  %v191_v42 = vmul.f32 0.0125, %v189_v41 }
 0x228   :  { %v193_v43 = vadd.f32 1e-05, %v191_v42 }
 0x22a   :  { %1614 = vrsqrt.f32 %v193_v43 }
 0x233   :  { %v1613_v44 = vpop.eup %1612 }
 0x234   :  { %v196_v45 = vmul.f32 %v1613_v44, %v180_v19  ;;  %v220_v19 = vsub.s32 1, %v1884_v56  ;;  %v1608_v56 = vld [vmem:[#allocation7 + $0x18] sm:$0xff]  }
 0x236   :  { %v198_v49 = vmul.f32 %v196_v45, %v94_v46  ;;  %v221_v24 = vrot.slane %v88_v58, %v220_v19 }
 0x237   :  { %v1615_v47 = vpop.eup %1614 }
 0x238   :  { %v197_v48 = vmul.f32 %v1615_v47, %v181_v23  ;;  %v200_v52 = vadd.f32 %v198_v49, %v95_v50 }
 0x23a   :  { %v199_v51 = vmul.f32 %v197_v48, %v94_v46 }
 0x23c   :  { %v201_v53 = vadd.f32 %v199_v51, %v95_v50 }
 0x23e   :  { %v202_v54 = vpack.c.bf16 %v201_v53, %v200_v52 }
 0x240   :  { %1341 = vmatmul.mubr.msk.bf16.vlgmr.msra.gmra.mxu1 %vm170_vm3, %v202_v54 }
 0x241   :  { %1467 = vmatprep.mubr.msk.bf16.mxu1 %vm1755_vm0, %v1754_v0 }
 0x300   :  { %v311_v60 = vpop.f32.mrf.mxu1 }
 0x301   :  { %v312_v61 = vadd.f32 %v311_v60, %v217_v59 }
 0x302   :  { %v313_v62 = vpop.f32.mrf.mxu1 }
 0x303   :  { %v324_v63 = vpack.c.bf16 %v312_v61, %v312_v61  ;;  %v320_v6 = vmul.f32 0.15811388, %v312_v61  ;;  %v314_v29 = vadd.f32 %v313_v62, %v221_v24 }
 0x304   :  { %v315_v1 = vpop.f32.mrf.mxu1 }
 0x305   :  { %v316_v2 = vadd.f32 %v315_v1, %v217_v59  ;;  %329 = vrot.lane.b32.xlu0 %v324_v63, %s1757_s2  ;;  %v322_v8 = vpack.c.bf16 %v320_v6, %v320_v6  ;;  %v1911_v30 = vpack.c.bf16 %v314_v29, %v314_v29 }
 0x306   :  { %v317_v22 = vpop.f32.mrf.mxu1 }
 0x307   :  { %v1889_v3 = vpack.c.bf16 %v316_v2, %v316_v2  ;;  %v321_v11 = vmul.f32 0.15811388, %v316_v2  ;;  %v318_v26 = vadd.f32 %v317_v22, %v221_v24 }
 0x309   :  { %378 = vrot.lane.b32.xlu1 %v1889_v3, %s1757_s2  ;;  %v323_v12 = vpack.c.bf16 %v321_v11, %v321_v11  ;;  %v1907_v28 = vpack.c.bf16 %v318_v26, %v318_v26 }
 0x377   :  { %v330_v4 = vpop.permute.xlu0 %329 }
 0x378   :  { %v335_v5 = vsel %vm121_vm2, %v330_v4, 0 }
 0x379   :  { %1454 = vmatpush3.bf16.xpose.msra.mxu0 %v335_v5 }
 0x37a   :  { %1459 = vmatprep.subr.bf16.mxu0 %v1754_v0 }
 0x37b   :  { %v379_v7 = vpop.permute.xlu1 %378 }
 0x37c   :  { %v384_v9 = vsel %vm121_vm2, %v379_v7, 0 }
 0x380   :  { %1456 = vmatmul.mubr.msk.bf16.vlgmr.msra.gmra.mxu0 %vm121_vm2, %v322_v8 }
 0x381   :  { %1460 = vmatpush3.bf16.xpose.msra.mxu0 %v384_v9  ;;  %1461 = vmatprep.mubr.msk.bf16.mxu0 %vm1755_vm0, %v1754_v0 }
 0x382   :  { %1471 = vmatprep.subr.bf16.mxu0 %v1754_v0 }
 0x388   :  { %1462 = vmatmul.mubr.msk.bf16.vlgmr.msra.gmra.mxu0 %vm121_vm2, %v323_v12 }
 0x389   :  { %1473 = vmatprep.mubr.msk.bf16.mxu0 %vm1755_vm0, %v1754_v0 }
 0x440   :  { %v371_v13 = vpop.f32.mrf.mxu0 }
 0x441   :  { %v427_v15 = vsel %vm426_vm4, %v371_v13, -inf }
 0x442   :  { %428 = vmax.xlane.f32.xlu1 %v427_v15  ;;  %v1457_v16 = vpop.f32.mrf.mxu0 }
 0x444   :  { %v374_v17 = vpop.f32.mrf.mxu0 }
 0x446   :  { %v1458_v18 = vpop.f32.mrf.mxu0 }
 0x448   :  { %v420_v20 = vpop.f32.mrf.mxu0 }
 0x449   :  { %v430_v21 = vsel %vm426_vm4, %v420_v20, -inf }
 0x44a   :  { %431 = vmax.xlane.f32.xlu0 %v430_v21  ;;  %v1463_v23 = vpop.f32.mrf.mxu0 }
 0x44c   :  { %v423_v25 = vpop.f32.mrf.mxu0 }
 0x44e   :  { %v1464_v27 = vpop.f32.mrf.mxu0 }
 0x453   :  { %501 = vrot.lane.b32.xlu1 %v1907_v28, %s1758_s0 }
 0x457   :  { %552 = vrot.lane.b32.xlu1 %v324_v63, %s1749_s16 }
 0x45b   :  { %554 = vrot.lane.b32.xlu1 %v1911_v30, %s1749_s16 }
 0x460   :  { %452 = vrot.lane.b32.xlu0 %v1911_v30, %s1758_s0 }
 0x4cb   :  { %v429_v31 = vpop.xlane.xlu1 %428 }
 0x4cc   :  { %v433_v33 = vsub.f32 %v371_v13, %v429_v31 }
 0x4ce   :  { %v435_v34 = vmul.f32 1.442695, %v433_v33 }
 0x4cf   :  { %v502_v35 = vpop.permute.xlu1 %501 }
 0x4d0   :  { %1616 = vpow2.f32 %v435_v34  ;;  %v507_v36 = vsel %vm125_vm1, %v502_v35, 0 }
 0x4d1   :  { %1472 = vmatpush3.bf16.msra.mxu0 %v507_v36 }
 0x4d2   :  { %1483 = vmatprep.subr.bf16.mxu0 %v1754_v0 }
 0x4d3   :  { %v432_v37 = vpop.xlane.xlu0 %431  ;;  %v553_v46 = vpop.permute.xlu1 %552 }
 0x4d4   :  { %v434_v38 = vsub.f32 %v420_v20, %v432_v37 }
 0x4d6   :  { %v437_v39 = vmul.f32 1.442695, %v434_v38 }
 0x4d7   :  { %v453_v40 = vpop.permute.xlu0 %452  ;;  %v555_v48 = vpop.permute.xlu1 %554 }
 0x4d8   :  { %1618 = vpow2.f32 %v437_v39  ;;  %v458_v41 = vsel %vm125_vm1, %v453_v40, 0  ;;  %v557_v52 = vsel %vm426_vm4, %v553_v46, %v555_v48  ;;  %v1572_v48 = vld [vmem:[%s2101_s3 + $0x18] sm:$0xff]  }
 0x4d9   :  { %1466 = vmatpush3.bf16.msra.mxu1 %v458_v41  ;;  %v562_v54 = vsel %vm121_vm2, %v557_v52, 0 }
 0x4da   :  { %1477 = vmatprep.subr.bf16.mxu1 %v1754_v0 }
 0x4dd   :  { %v1617_v42 = vpop.eup %1616 }
 0x4de   :  { %v439_v43 = vsel %vm426_vm4, %v1617_v42, 0.0 }
 0x4df   :  { %440 = vadd.xlane.f32.xlu0 %v439_v43 }
 0x4e5   :  { %v1619_v44 = vpop.eup %1618 }
 0x4e6   :  { %v442_v45 = vsel %vm426_vm4, %v1619_v44, 0.0 }
 0x4e7   :  { %443 = vadd.xlane.f32.xlu1 %v442_v45 }
 0x4f5   :  { %607 = vrot.lane.b32.xlu0 %v1889_v3, %s1749_s16 }
 0x4f8   :  { %609 = vrot.lane.b32.xlu1 %v1907_v28, %s1749_s16  ;;  %s1760_s16 = smov 56  }
 0x4f9   :  { %550 = vrot.lane.b32.xlu0 %v322_v8, %s1759_s25 }
 0x4fc   :  { %605 = vrot.lane.b32.xlu1 %v323_v12, %s1759_s25 }
 0x568   :  { %v441_v47 = vpop.xlane.xlu0 %440 }
 0x569   :  { %1620 = vrcp.f32 %v441_v47  ;;  %v1571_v47 = vld [vmem:[%s2101_s3 + $0x20] sm:$0xff]  }
 0x56c   :  { %v608_v55 = vpop.permute.xlu0 %607 }
 0x570   :  { %v444_v49 = vpop.xlane.xlu1 %443  ;;  %v551_v63 = vpop.permute.xlu0 %550 }
 0x571   :  { %1622 = vrcp.f32 %v444_v49  ;;  %v1573_v49 = vld [vmem:[%s2101_s3 + $0x10] sm:$0xff]  }
 0x574   :  { %v610_v58 = vpop.permute.xlu1 %609 }
 0x575   :  { %v611_v61 = vsel %vm426_vm4, %v608_v55, %v610_v58 }
 0x576   :  { %v1621_v50 = vpop.eup %1620  ;;  %v616_v1 = vsel %vm121_vm2, %v611_v61, 0 }
 0x577   :  { %v447_v51 = vmul.f32 %v1621_v50, %v1617_v42  ;;  %v1575_v50 = vld [vmem:[%s2101_s3] sm:$0xff]  }
 0x578   :  { %v606_v2 = vpop.permute.xlu1 %605 }
 0x579   :  { %v449_v53 = vpack.c.bf16 %v447_v51, %v447_v51 }
 0x57b   :  { %1468 = vmatmul.mubr.msk.bf16.vlgmr.msra.gmra.mxu1 %vm426_vm4, %v449_v53 }
 0x57c   :  { %1478 = vmatpush3.bf16.xpose.msra.mxu1 %v562_v54  ;;  %1479 = vmatprep.mubr.msk.bf16.mxu1 %vm1755_vm0, %v1754_v0 }
 0x57d   :  { %1489 = vmatprep.subr.bf16.mxu1 %v1754_v0 }
 0x57e   :  { %v1623_v59 = vpop.eup %1622 }
 0x57f   :  { %v448_v60 = vmul.f32 %v1623_v59, %v1619_v44 }
 0x581   :  { %v450_v62 = vpack.c.bf16 %v448_v60, %v448_v60 }
 0x583   :  { %1474 = vmatmul.mubr.msk.bf16.vlgmr.msra.gmra.mxu0 %vm426_vm4, %v450_v62  ;;  %1480 = vmatmul.mubr.msk.bf16.vlgmr.msra.gmra.mxu1 %vm121_vm2, %v551_v63 }
 0x584   :  { %1484 = vmatpush3.bf16.xpose.msra.mxu0 %v616_v1  ;;  %1485 = vmatprep.mubr.msk.bf16.mxu0 %vm1755_vm0, %v1754_v0 }
 0x585   :  { %1495 = vmatprep.subr.bf16.mxu0 %v1754_v0  ;;  %1491 = vmatprep.mubr.msk.bf16.mxu1 %vm1755_vm0, %v1754_v0 }
 0x58b   :  { %1486 = vmatmul.mubr.msk.bf16.vlgmr.msra.gmra.mxu0 %vm121_vm2, %v606_v2 }
 0x58c   :  { %1497 = vmatprep.mubr.msk.bf16.mxu0 %vm1755_vm0, %v1754_v0 }
 0x63b   :  { %v1944_v3 = vpop.f32.mrf.mxu1 }
 0x63d   :  { %v1469_v4 = vpop.f32.mrf.mxu1 }
 0x63f   :  { %v497_v5 = vpop.f32.mrf.mxu1 }
 0x641   :  { %v1470_v6 = vpop.f32.mrf.mxu1 }
 0x642   :  { %v89_v6 = vld [vmem:[#allocation8 + $0x2] ss:$0 sm:$0xff] }
 0x643   :  { %v1946_v7 = vpop.f32.mrf.mxu0  ;;  %v598_v8 = vpop.f32.mrf.mxu1 }
 0x644   :  { %v658_v9 = vsel %vm426_vm4, %v598_v8, -inf }
 0x645   :  { %659 = vmax.xlane.f32.xlu0 %v658_v9  ;;  %v1475_v11 = vpop.f32.mrf.mxu0  ;;  %v1481_v12 = vpop.f32.mrf.mxu1 }
 0x647   :  { %v546_v13 = vpop.f32.mrf.mxu0  ;;  %v601_v15 = vpop.f32.mrf.mxu1 }
 0x649   :  { %v1476_v16 = vpop.f32.mrf.mxu0  ;;  %v1482_v17 = vpop.f32.mrf.mxu1 }
 0x64b   :  { %v652_v18 = vpop.f32.mrf.mxu0 }
 0x64c   :  { %v661_v20 = vsel %vm426_vm4, %v652_v18, -inf }
 0x64d   :  { %662 = vmax.xlane.f32.xlu1 %v661_v20  ;;  %v1487_v21 = vpop.f32.mrf.mxu0 }
 0x64f   :  { %v655_v22 = vpop.f32.mrf.mxu0 }
 0x651   :  { %v1488_v23 = vpop.f32.mrf.mxu0 }
 0x65e   :  { %730 = vrot.lane.b32.xlu1 %v1907_v28, %s1760_s16 }
 0x6ce   :  { %v660_v24 = vpop.xlane.xlu0 %659 }
 0x6cf   :  { %v664_v25 = vsub.f32 %v598_v8, %v660_v24 }
 0x6d1   :  { %v666_v26 = vmul.f32 1.442695, %v664_v25 }
 0x6d3   :  { %1624 = vpow2.f32 %v666_v26 }
 0x6d6   :  { %v663_v27 = vpop.xlane.xlu1 %662 }
 0x6d7   :  { %v665_v29 = vsub.f32 %v652_v18, %v663_v27  ;;  %v1578_v27 = vld [vmem:[%s2102_s4 + $0x44] ss:$8 sps:$4 sm:$0xff]  }
 0x6d9   :  { %v668_v31 = vmul.f32 1.442695, %v665_v29  ;;  %v1576_v29 = vld [vmem:[%s2102_s4 + $0x40] ss:$8 sps:$4 sm:$0xff]  }
 0x6da   :  { %v731_v33 = vpop.permute.xlu1 %730 }
 0x6db   :  { %1626 = vpow2.f32 %v668_v31  ;;  %v736_v34 = vsel %vm125_vm1, %v731_v33, 0  ;;  %v1581_v31 = vld [vmem:[%s2102_s4 + $0x34] ss:$8 sps:$4 sm:$0xff]   ;;  %v1579_v33 = vld [vmem:[%s2102_s4 + $0x30] ss:$8 sps:$4 sm:$0xff]  }
 0x6dc   :  { %1496 = vmatpush3.bf16.msra.mxu0 %v736_v34  ;;  %v1584_v34 = vld [vmem:[%s2102_s4 + $0x24] ss:$8 sps:$4 sm:$0xff]  }
 0x6dd   :  { %986 = vmatprep.subr.bf16.mxu0 %v1578_v27 }
 0x6e0   :  { %v1625_v35 = vpop.eup %1624 }
 0x6e1   :  { %v670_v36 = vsel %vm426_vm4, %v1625_v35, 0.0 }
 0x6e2   :  { %671 = vadd.xlane.f32.xlu0 %v670_v36  ;;  %v1587_v36 = vld [vmem:[%s2102_s4 + $0x14] ss:$8 sps:$4 sm:$0xff]  }
 0x6e8   :  { %v1627_v37 = vpop.eup %1626 }
 0x6e9   :  { %v673_v38 = vsel %vm426_vm4, %v1627_v37, 0.0 }
 0x6ea   :  { %674 = vadd.xlane.f32.xlu0 %v673_v38  ;;  %v1590_v38 = vld [vmem:[%s2102_s4 + $0x4] ss:$8 sps:$4 sm:$0xff]  }
 0x700   :  { %682 = vrot.lane.b32.xlu0 %v1911_v30, %s1760_s16 }
 0x76b   :  { %v672_v28 = vpop.xlane.xlu0 %671 }
 0x76c   :  { %1628 = vrcp.f32 %v672_v28  ;;  %v1588_v28 = vld [vmem:[%s2102_s4] ss:$8 sps:$4 sm:$0xff]  }
 0x773   :  { %v675_v39 = vpop.xlane.xlu0 %674 }
 0x774   :  { %1630 = vrcp.f32 %v675_v39  ;;  %v1591_v39 = vld [vmem:[%s2103_s5 + $0x78] sm:$0xff]  }
 0x777   :  { %v683_v40 = vpop.permute.xlu0 %682 }
 0x778   :  { %v688_v41 = vsel %vm125_vm1, %v683_v40, 0  ;;  %v1592_v40 = vld [vmem:[%s2103_s5 + $0x38] sm:$0xff]  }
 0x779   :  { %v1629_v42 = vpop.eup %1628  ;;  %1490 = vmatpush3.bf16.msra.mxu1 %v688_v41  ;;  %v1593_v41 = vld [vmem:[%s2103_s5 + $0x70] sm:$0xff]  }
 0x77a   :  { %v678_v43 = vmul.f32 %v1629_v42, %v1625_v35  ;;  %1501 = vmatprep.subr.bf16.mxu1 %v1754_v0  ;;  %v1582_v35 = vld [vmem:[%s2102_s4 + $0x20] ss:$8 sps:$4 sm:$0xff]   ;;  %v1594_v42 = vld [vmem:[%s2103_s5 + $0x30] sm:$0xff]  }
 0x77c   :  { %v680_v44 = vpack.c.bf16 %v678_v43, %v678_v43  ;;  %v1595_v43 = vld [vmem:[%s2103_s5 + $0x68] sm:$0xff]  }
 0x77e   :  { %1492 = vmatmul.mubr.msk.bf16.vlgmr.msra.gmra.mxu1 %vm426_vm4, %v680_v44  ;;  %v1596_v44 = vld [vmem:[%s2103_s5 + $0x28] sm:$0xff]  }
 0x77f   :  { %1511 = vmatprep.mubr.msk.bf16.mxu1 %vm1755_vm0, %v1754_v0  ;;  %1502 = vmatpush3.bf16.msra.mxu1 %v1571_v47  ;;  %v1600_v47 = vld [vmem:[%s2103_s5 + $0x18] sm:$0xff]  }
 0x780   :  { %1503 = vmatprep.subr.bf16.mxu1 %v1754_v0 }
 0x781   :  { %v1631_v45 = vpop.eup %1630 }
 0x782   :  { %v679_v30 = vmul.f32 %v1631_v45, %v1627_v37  ;;  %v1585_v37 = vld [vmem:[%s2102_s4 + $0x10] ss:$8 sps:$4 sm:$0xff]   ;;  %v1597_v45 = vld [vmem:[%s2103_s5 + $0x60] sm:$0xff]  }
 0x783   :  { %1504 = vmatpush3.bf16.msra.mxu1 %v1572_v48 }
 0x784   :  { %v681_v46 = vpack.c.bf16 %v679_v30, %v679_v30  ;;  %1505 = vmatprep.subr.bf16.mxu1 %v1754_v0  ;;  %v1598_v30 = vld [vmem:[%s2103_s5 + $0x20] sm:$0xff]  }
 0x786   :  { %1498 = vmatmul.mubr.msk.bf16.vlgmr.msra.gmra.mxu0 %vm426_vm4, %v681_v46  ;;  %v1599_v46 = vld [vmem:[%s2103_s5 + $0x58] sm:$0xff]  }
 0x787   :  { %1012 = vmatprep.mubr.bf16.mxu0 %v1756_v32  ;;  %1506 = vmatpush3.bf16.msra.mxu1 %v1573_v49  ;;  %v1574_v32 = vld [vmem:[%s2101_s3 + $0x8] sm:$0xff]  }
 0x788   :  { %1507 = vmatprep.subr.bf16.mxu1 %v1754_v0  ;;  %987 = vmatpush1.bf16.msra.mxu0 %v1576_v29 }
 0x789   :  { %988 = vmatprep.subr.bf16.mxu0 %v1581_v31  ;;  %v1607_v31 = vld [vmem:[#allocation7 + $0x20] sm:$0xff]  }
 0x78b   :  { %1508 = vmatpush3.bf16.msra.mxu1 %v1574_v32 }
 0x78c   :  { %1509 = vmatprep.subr.bf16.mxu1 %v1754_v0  ;;  %989 = vmatpush1.bf16.msra.mxu0 %v1579_v33  ;;  %v1611_v33 = vld [vmem:[#allocation7] sm:$0xff]  }
 0x78d   :  { %990 = vmatprep.subr.bf16.mxu0 %v1584_v34 }
 0x78f   :  { %1510 = vmatpush3.bf16.msra.mxu1 %v1575_v50 }
 0x790   :  { %991 = vmatpush1.bf16.msra.mxu0 %v1582_v35  ;;  %1415 = vmatprep.subr.bf16.mxu1 %v1591_v39  ;;  %v92_v35 = vld [vmem:[#allocation8 + $0x4] ss:$0 sm:$0xff] }
 0x791   :  { %992 = vmatprep.subr.bf16.mxu0 %v1587_v36 }
 0x794   :  { %993 = vmatpush1.bf16.msra.mxu0 %v1585_v37 }
 0x795   :  { %994 = vmatprep.subr.bf16.mxu0 %v1590_v38 }
 0x798   :  { %995 = vmatpush1.bf16.msra.mxu0 %v1588_v28 }
 0x799   :  { %1515 = vmatprep.subr.bf16.mxu0 %v1754_v0 }
 0x83e   :  { %v724_v51 = vpop.f32.mrf.mxu1 }
 0x840   :  { %v1493_v52 = vpop.f32.mrf.mxu1 }
 0x842   :  { %v727_v53 = vpop.f32.mrf.mxu1 }
 0x844   :  { %v1494_v54 = vpop.f32.mrf.mxu1 }
 0x846   :  { %v772_v55 = vpop.f32.mrf.mxu0 }
 0x847   :  { %v1548_v58 = vpack.i.bf16 %v772_v55, %v724_v51  ;;  %v96_v55 = vld [vmem:[#allocation8 + $0x10] ss:$0 sm:$0xff] }
 0x848   :  { %v1499_v59 = vpop.f32.mrf.mxu0 }
 0x849   :  { %1549 = vrot.lane.b32.xlu1 %v1548_v58, %s1761_s12 }
 0x84a   :  { %v775_v60 = vpop.f32.mrf.mxu0 }
 0x84c   :  { %v1500_v61 = vpop.f32.mrf.mxu0 }
 0x84d   :  { %v97_v61 = vld [vmem:[#allocation8 + $0x11] ss:$0 sm:$0xff] }
 0x8bb   :  { %v1550_v62 = vpop.permute.xlu1 %1549 }
 0x8bc   :  { %v1552_v63 = vunpack.i.h.bf16 %v1550_v62  ;;  %v1551_v1 = vunpack.i.l.bf16 %v1550_v62 }
 0x8be   :  { %v787_v2 = vsel %vm121_vm2, %v1946_v7, %v1552_v63  ;;  %v786_v4 = vsel %vm121_vm2, %v1944_v3, %v1551_v1 }
 0x8bf   :  { %v788_v5 = vpack.c.bf16 %v787_v2, %v786_v4  ;;  %v1601_v4 = vld [vmem:[%s2103_s5 + $0x50] sm:$0xff]  }
 0x8c1   :  { %1512 = vmatmul.mubr.msk.bf16.vlgmr.msra.gmra.mxu1 %vm170_vm3, %v788_v5  ;;  %v1602_v5 = vld [vmem:[%s2103_s5 + $0x10] sm:$0xff]  }
 0x8c2   :  { %1416 = vmatpush3.bf16.msra.mxu1 %v1592_v40 }
 0x8c3   :  { %1417 = vmatprep.subr.bf16.mxu1 %v1593_v41 }
 0x8c6   :  { %1418 = vmatpush3.bf16.msra.mxu1 %v1594_v42 }
 0x8c7   :  { %1419 = vmatprep.subr.bf16.mxu1 %v1595_v43 }
 0x8ca   :  { %1420 = vmatpush3.bf16.msra.mxu1 %v1596_v44 }
 0x8cb   :  { %1421 = vmatprep.subr.bf16.mxu1 %v1597_v45 }
 0x8ce   :  { %1422 = vmatpush3.bf16.msra.mxu1 %v1598_v30 }
 0x8cf   :  { %1423 = vmatprep.subr.bf16.mxu1 %v1599_v46 }
 0x8d2   :  { %1424 = vmatpush3.bf16.msra.mxu1 %v1600_v47 }
 0x8d3   :  { %1425 = vmatprep.subr.bf16.mxu1 %v1601_v4 }
 0x8d6   :  { %1426 = vmatpush3.bf16.msra.mxu1 %v1602_v5 }
 0x981   :  { %v866_v8 = vpop.f32.mrf.mxu1 }
 0x982   :  { %v867_v9 = vadd.f32 %v866_v8, %v89_v6  ;;  %v1604_v8 = vld [vmem:[%s2103_s5 + $0x8] sm:$0xff]  }
 0x983   :  { %v1513_v11 = vpop.f32.mrf.mxu1 }
 0x984   :  { %v1987_v12 = vadd.f32 %v867_v9, %v1837_v10  ;;  %v1605_v9 = vld [vmem:[%s2103_s5 + $0x40] sm:$0xff]  }
 0x985   :  { %v869_v13 = vpop.f32.mrf.mxu1  ;;  %v1606_v11 = vld [vmem:[%s2103_s5] sm:$0xff]  }
 0x986   :  { %v870_v15 = vadd.f32 %v869_v13, %v89_v6  ;;  %v875_v16 = vsel %vm170_vm3, %v1987_v12, 0.0  ;;  %v1603_v6 = vld [vmem:[%s2103_s5 + $0x48] sm:$0xff]   ;;  %s1762_s5 = smov [#allocation10]  }
 0x987   :  { %876 = vadd.xlane.f32.xlu1 %v875_v16  ;;  %v1514_v7 = vpop.f32.mrf.mxu1  ;;  %1427 = vmatprep.subr.bf16.mxu1 %v1603_v6  ;;  %v91_v13 = vld [vmem:[#allocation8 + $0x3] ss:$8 sm:$0x3]  ;;  %s1316_s30 = sshll.u32 %s1762_s5, 4  ;;  %s1317_s30 = int_to_ptr.vmem [resolvable:$true] %s1316_s30 }
 0x988   :  { %v1992_v17 = vadd.f32 %v870_v15, %v1841_v14  ;;  %1428 = vmatpush3.bf16.msra.mxu1 %v1604_v8  ;;  %v924_v16 = vrot.slane %v91_v13, %v220_v19  ;;  %v920_v7 = vrot.slane %v91_v13, %v216_v57  ;;  %v1609_v57 = vld [vmem:[#allocation7 + $0x10] sm:$0xff]   ;;  %v1610_v19 = vld [vmem:[#allocation7 + $0x8] sm:$0xff]   ;;  %s1716_s9 = scalar_lea.vmem %s1317_s30, 32  ;;  %p1721_p7 = scmp.lt.s32.totalorder %s1317_s30, %s1317_s30 }
 0x989   :  { %1429 = vmatprep.subr.bf16.mxu1 %v1605_v9  ;;  %p1717_p6 = scmp.ne.s32.totalorder %s1317_s30, %s1716_s9  ;;  %p1722_p8 = scmp.lt.s32.totalorder %s1716_s9, %s1716_s9 }
 0x98a   :  { %v878_v3 = vsel %vm170_vm3, %v1992_v17, 0.0 }
 0x98b   :  { %879 = vadd.xlane.f32.xlu0 %v878_v3  ;;  %p1723_p9 = por %p1722_p8, %p1721_p7 }
 0x98c   :  { %1430 = vmatpush3.bf16.msra.mxu1 %v1606_v11 }
 0x98d   :  { %p1724_p10 = pnand %p1723_p9, %p1717_p6 }
 0xa10   :  { %v877_v18 = vpop.xlane.xlu1 %876 }
 0xa11   :  { %v881_v20 = vmul.f32 0.0125, %v877_v18 }
 0xa13   :  { %v883_v21 = vsub.f32 %v1987_v12, %v881_v20 }
 0xa14   :  { %v880_v10 = vpop.xlane.xlu0 %879 }
 0xa15   :  { %v882_v22 = vmul.f32 0.0125, %v880_v10  ;;  %v885_v23 = vmul.f32 %v883_v21, %v883_v21 }
 0xa17   :  { %v884_v24 = vsub.f32 %v1992_v17, %v882_v22  ;;  %v887_v25 = vsel %vm170_vm3, %v885_v23, 0.0 }
 0xa18   :  { %888 = vadd.xlane.f32.xlu0 %v887_v25 }
 0xa19   :  { %v886_v26 = vmul.f32 %v884_v24, %v884_v24 }
 0xa1b   :  { %v890_v14 = vsel %vm170_vm3, %v886_v26, 0.0 }
 0xa1c   :  { %891 = vadd.xlane.f32.xlu0 %v890_v14 }
 0xaa1   :  { %v889_v48 = vpop.xlane.xlu0 %888 }
 0xaa2   :  { %v893_v49 = vmul.f32 0.0125, %v889_v48 }
 0xaa4   :  { %v895_v32 = vadd.f32 1e-05, %v893_v49 }
 0xaa5   :  { %v892_v50 = vpop.xlane.xlu0 %891 }
 0xaa6   :  { %1632 = vrsqrt.f32 %v895_v32  ;;  %v894_v51 = vmul.f32 0.0125, %v892_v50 }
 0xaa8   :  { %v896_v52 = vadd.f32 1e-05, %v894_v51 }
 0xaaa   :  { %1634 = vrsqrt.f32 %v896_v52 }
 0xab3   :  { %v1633_v53 = vpop.eup %1632 }
 0xab4   :  { %v899_v54 = vmul.f32 %v1633_v53, %v883_v21 }
 0xab6   :  { %v901_v60 = vmul.f32 %v899_v54, %v96_v55 }
 0xab7   :  { %v1635_v58 = vpop.eup %1634 }
 0xab8   :  { %v900_v59 = vmul.f32 %v1635_v58, %v884_v24  ;;  %v903_v63 = vadd.f32 %v901_v60, %v97_v61 }
 0xaba   :  { %v902_v62 = vmul.f32 %v900_v59, %v96_v55 }
 0xabc   :  { %v904_v1 = vadd.f32 %v902_v62, %v97_v61 }
 0xabe   :  { %v905_v2 = vpack.c.bf16 %v904_v1, %v903_v63  ;;  %v93_v63 = vld [vmem:[#allocation8 + $0x5] ss:$0 sm:$0xff] }
 0xac0   :  { %1366 = vmatmul.mubr.msk.bf16.vlgmr.msra.gmra.mxu0 %vm170_vm3, %v905_v2 }
 0xac1   :  { %1525 = vmatprep.mubr.msk.bf16.mxu0 %vm1755_vm0, %v1754_v0  ;;  %1516 = vmatpush3.bf16.msra.mxu0 %v1607_v31 }
 0xac2   :  { %1517 = vmatprep.subr.bf16.mxu0 %v1754_v0 }
 0xac5   :  { %1518 = vmatpush3.bf16.msra.mxu0 %v1608_v56 }
 0xac6   :  { %1519 = vmatprep.subr.bf16.mxu0 %v1754_v0 }
 0xac9   :  { %1520 = vmatpush3.bf16.msra.mxu0 %v1609_v57 }
 0xaca   :  { %1521 = vmatprep.subr.bf16.mxu0 %v1754_v0 }
 0xacd   :  { %1522 = vmatpush3.bf16.msra.mxu0 %v1610_v19 }
 0xace   :  { %1523 = vmatprep.subr.bf16.mxu0 %v1754_v0 }
 0xad1   :  { %1524 = vmatpush3.bf16.msra.mxu0 %v1611_v33 }
 0xb80   :  { %v1014_v15 = vpop.f32.mrf.mxu0 }
 0xb81   :  { %v1015_v10 = vadd.f32 %v1014_v15, %v920_v7 }
 0xb82   :  { %v1016_v3 = vpop.f32.mrf.mxu0 }
 0xb83   :  { %v1017_v20 = vadd.f32 %v1016_v3, %v924_v16  ;;  %v1023_v14 = vmax.f32 %v1015_v10, 0.0 }
 0xb84   :  { %v1018_v18 = vpop.f32.mrf.mxu0 }
 0xb85   :  { %v1019_v21 = vadd.f32 %v1018_v18, %v920_v7  ;;  %v1024_v25 = vmax.f32 %v1017_v20, 0.0 }
 0xb86   :  { %v1020_v22 = vpop.f32.mrf.mxu0 }
 0xb87   :  { %v1021_v23 = vadd.f32 %v1020_v22, %v924_v16  ;;  %v1025_v24 = vmax.f32 %v1019_v21, 0.0 }
 0xb89   :  { %v1026_v26 = vmax.f32 %v1021_v23, 0.0  ;;  %v1027_v29 = vpack.c.bf16 %v1025_v24, %v1023_v14 }
 0xb8b   :  { %v1028_v27 = vpack.c.bf16 %v1026_v26, %v1024_v25 }
 0xb8d   :  { %1189 = vmatprep.mubr.bf16.mxu1 %v1028_v27 }
 0xb8e   :  { %1190 = vmatmul.mubr.bf16.vlgmr.msra.gmra.mxu1 %v1027_v29 }
 0xc4e   :  { %v1431_v34 = vpop.f32.mrf.mxu1 }
 0xc50   :  { %v1432_v36 = vpop.f32.mrf.mxu1 }
 0xc51   :  { %v1433_v37 = vadd.f32 %v1432_v36, %v1431_v34 }
 0xc52   :  { %v1434_v38 = vpop.f32.mrf.mxu1 }
 0xc53   :  { %v1192_v28 = vadd.f32 %v1433_v37, %v92_v35 }
 0xc54   :  { %v1435_v39 = vpop.f32.mrf.mxu1 }
 0xc55   :  { %v1198_v40 = vadd.f32 %v1192_v28, %v1987_v12  ;;  %v1436_v41 = vadd.f32 %v1435_v39, %v1434_v38 }
 0xc57   :  { %v1200_v42 = vsel %vm170_vm3, %v1198_v40, 0.0  ;;  %v1195_v43 = vadd.f32 %v1436_v41, %v92_v35 }
 0xc58   :  { %v1201_v44 = vrot.slane %v1200_v42, 4 }
 0xc59   :  { %v1199_v45 = vadd.f32 %v1195_v43, %v1992_v17 }
 0xc5a   :  { %v1202_v30 = vadd.f32 %v1201_v44, %v1200_v42 }
 0xc5b   :  { %v1207_v0 = vsel %vm170_vm3, %v1199_v45, 0.0 }
 0xc5c   :  { %v1203_v46 = vrot.slane %v1202_v30, 2  ;;  %v1208_v47 = vrot.slane %v1207_v0, 4 }
 0xc5e   :  { %v1204_v48 = vadd.f32 %v1203_v46, %v1202_v30  ;;  %v1209_v49 = vadd.f32 %v1208_v47, %v1207_v0 }
 0xc60   :  { %v1205_v32 = vrot.slane %v1204_v48, 1  ;;  %v1210_v50 = vrot.slane %v1209_v49, 2 }
 0xc62   :  { %v1206_v51 = vadd.f32 %v1205_v32, %v1204_v48  ;;  %v1211_v52 = vadd.f32 %v1210_v50, %v1209_v49 }
 0xc64   :  { %v1215_v53 = vmul.f32 0.125, %v1206_v51  ;;  %v1212_v12 = vrot.slane %v1211_v52, 1 }
 0xc66   :  { %v1213_v54 = vadd.f32 %v1212_v12, %v1211_v52  ;;  %v1217_v55 = vpack.c.bf16 %v1215_v53, %v1215_v53 }
 0xc68   :  { %v1216_v58 = vmul.f32 0.125, %v1213_v54  ;;  %v1231_v60 = vunpack.c.l.b16 %v1217_v55 }
 0xc6a   :  { %v1218_v59 = vpack.c.bf16 %v1216_v58, %v1216_v58 }
 0xc6c   :  { %v1232_v17 = vunpack.c.l.b16 %v1218_v59 }
 0xc6e   :  { %v1234_v61 = vsel %vm1233_vm5, %v1232_v17, %v1231_v60 }
 0xc6f   :  { %v1235_v62 = vpack.c.b16 %v1234_v61, %v1234_v61 }
 0xc71   :  { %1526 = vmatmul.mubr.msk.bf16.vlgmr.msra.gmra.mxu0 %vm170_vm3, %v1235_v62 }
 0xd31   :  { %v1303_v1 = vpop.f32.mrf.mxu0 }
 0xd32   :  { %v1304_v2 = vadd.f32 %v1303_v1, %v93_v63 }
 0xd33   :  { %v1527_v4 = vpop.f32.mrf.mxu0 }
 0xd34   :  { %1309 = vst [vmem:[#allocation10] sm:$0x3] %v1304_v2 }
 0xd35   :  { %v1306_v5 = vpop.f32.mrf.mxu0 }
 0xd36   :  { %1727 = shalt.err (!%p1724_p10)
}
 0xd37   :  { %1319 = dma.vmem_to_hbm [thread:$0]  %s1317_s30, 32, %s2106_s8, [#allocation4]   ;;  %v1528_v6 = vpop.f32.mrf.mxu0 }
 0xd38   :  { %1742 = dma.done.wait [#allocation4], 32  }
 0xd39   :  { %1743 = vsyncadd [#allocation4], 4294967264 }
 0xd3a   :  { %1323 = vsyncpa [#allocation3], 1 }
 0xd3b   :  { %1324 = vsyncpa [#allocation6], 1 }
 0xd3c   :  { %1325 = vsyncpa [#allocation9], 1 }
 0xd3d   :  { %1326 = vsyncpa [#allocation4], 1 }

</bundles_post_ra>
